<compile_context>
chip_gen: v7x
topology: tpu7x:2x2x1
jax: 0.10.0
libtpu: 0.0.40
codegen_flags: <defaults>
</compile_context>

<pallas_src>
import functools

import jax
import jax.numpy as jnp
from jax.experimental import pallas as pl
from jax.experimental.pallas import tpu as pltpu


_LN_EPS = 1e-5


def _default_vmem_limit_bytes():
    """Generation-aware scoped-VMEM budget: ~3/4 of physical VMEM."""
    cap = 64 * 1024 * 1024
    try:
        info = pltpu.get_tpu_info()
        cap = getattr(info, "vmem_capacity_bytes", None) or cap
    except Exception:
        pass
    return min(int(cap) * 3 // 4, 112 * 1024 * 1024)


def _layernorm_f32(x, gamma, beta, eps=_LN_EPS):
    """LayerNorm with f32 statistics. `x` is f32; gamma/beta are (1, D)."""
    mu = jnp.mean(x, axis=-1, keepdims=True)
    var = jnp.mean(jnp.square(x - mu), axis=-1, keepdims=True)
    return (x - mu) * jax.lax.rsqrt(var + eps) * gamma + beta


# ---------------------------------------------------------------------------
# Kernel 1: fused QKV projection, tiled over output columns.
#   The q columns (first d_model of the 3*d_model output) are pre-scaled by
#   1/sqrt(d_k) so attention never rescales.
# ---------------------------------------------------------------------------
def _qkv_proj_kernel(x_ref, w_ref, b_ref, o_ref, *, scale, d_model, block_cols):
    col0 = pl.program_id(2) * block_cols              # first output column of this tile
    x = x_ref[0]                                      # (ts, D), input dtype (MXU operand)
    y = jnp.dot(x, w_ref[...], preferred_element_type=jnp.float32)
    y = y + b_ref[...].astype(jnp.float32)            # (ts, tn), f32 accumulation
    s = jnp.where(col0 < d_model, scale, 1.0)         # scale only the q column tiles
    o_ref[0] = (y * s).astype(o_ref.dtype)


# ---------------------------------------------------------------------------
# Kernel 2: head-batched flash attention (online softmax over kv tiles).
#   q/k/v/o blocks are full-width (tile, D) slabs; heads are split on
#   VMEM-resident data with static lane slices (cheap, XLU slot has slack).
# ---------------------------------------------------------------------------
def _flash_attn_kernel(q_ref, k_ref, v_ref, o_ref, m_sc, l_sc, acc_sc,
                       *, num_heads, d_k, exp_dtype):
    kv = pl.program_id(2)

    @pl.when(kv == 0)
    def _():
        m_sc[...] = jnp.full_like(m_sc, -jnp.inf)
        l_sc[...] = jnp.zeros_like(l_sc)
        acc_sc[...] = jnp.zeros_like(acc_sc)

    # Per-head online-softmax update.  Static unrolled loop (num_heads is small);
    # all HBM traffic stays lane-dense, only these VMEM lane slices are per-head.
    for h in range(num_heads):
        lo, hi = h * d_k, (h + 1) * d_k
        qh = q_ref[0, :, lo:hi]                       # (tq, dk), already 1/sqrt(dk)-scaled
        kh = k_ref[0, :, lo:hi]                       # (tk, dk)
        vh = v_ref[0, :, lo:hi]                       # (tk, dk)

        # scores = q @ k^T, f32 accumulation on the MXU.
        s = jax.lax.dot_general(qh, kh, (((1,), (1,)), ((), ())),
                                preferred_element_type=jnp.float32)   # (tq, tk)

        m_prev = m_sc[h]                              # (tq, 1)
        m_new = jnp.maximum(m_prev, jnp.max(s, axis=-1, keepdims=True))
        alpha = jnp.exp(m_prev - m_new)
        # exp in bf16 on bf16 models (values <= 0, bf16-safe; v6e/v7x EUP fast path),
        # statistics / accumulation stay f32.
        p = jnp.exp((s - m_new).astype(exp_dtype))
        l_sc[h] = alpha * l_sc[h] + jnp.sum(p.astype(jnp.float32), axis=-1,
                                            keepdims=True)
        acc_sc[h] = alpha * acc_sc[h] + jnp.dot(p.astype(vh.dtype), vh,
                                                preferred_element_type=jnp.float32)
        m_sc[h] = m_new

    @pl.when(kv == pl.num_programs(2) - 1)
    def _():
        # Exact normalization, once per q tile; output written as a dense (tq, D) slab.
        for h in range(num_heads):
            lo, hi = h * d_k, (h + 1) * d_k
            o_ref[0, :, lo:hi] = (acc_sc[h] / l_sc[h]).astype(o_ref.dtype)


# ---------------------------------------------------------------------------
# Kernel 3: out-proj + residual + LN1 + FFN (d_ff-tiled) + residual + LN2
# ---------------------------------------------------------------------------
def _post_attn_kernel(ctx_ref, x_ref, wo_ref, bo_ref, g1_ref, be1_ref,
                      w1_ref, b1_ref, w2_ref, b2_ref, g2_ref, be2_ref,
                      o_ref, h_sc, hc_sc, acc_sc):
    j = pl.program_id(2)

    @pl.when(j == 0)
    def _():
        ctx = ctx_ref[0]                                   # (ts, D), input dtype
        attn_out = jnp.dot(ctx, wo_ref[...], preferred_element_type=jnp.float32)
        attn_out = attn_out + bo_ref[...].astype(jnp.float32)
        res = x_ref[0].astype(jnp.float32) + attn_out      # dropout == identity
        h = _layernorm_f32(res, g1_ref[...].astype(jnp.float32),
                           be1_ref[...].astype(jnp.float32))
        h_sc[...] = h                                      # f32 copy for the final residual
        hc_sc[...] = h.astype(hc_sc.dtype)                 # compute-dtype copy, cast ONCE
        acc_sc[...] = jnp.zeros_like(acc_sc)

    # FFN, tiled over d_ff (reduction axis j): gelu(h @ W1_tile + b1_tile) @ W2_tile
    f = jnp.dot(hc_sc[...], w1_ref[...], preferred_element_type=jnp.float32)
    f = f + b1_ref[...].astype(jnp.float32)
    f = jax.nn.gelu(f, approximate=False)                  # erf gelu == F.gelu default
    acc_sc[...] += jnp.dot(f.astype(hc_sc.dtype), w2_ref[...],
                           preferred_element_type=jnp.float32)

    @pl.when(j == pl.num_programs(2) - 1)
    def _():
        ff = acc_sc[...] + b2_ref[...].astype(jnp.float32)
        out = _layernorm_f32(h_sc[...] + ff, g2_ref[...].astype(jnp.float32),
                             be2_ref[...].astype(jnp.float32))
        o_ref[0] = out.astype(o_ref.dtype)


# ---------------------------------------------------------------------------
# Wrapper
# ---------------------------------------------------------------------------
def prepare_params(params):
    """Fuse the Q/K/V projection weights ONCE (outside the per-forward path)."""
    p = dict(params)
    p['wqkv'] = jnp.concatenate([params['wq'], params['wk'], params['wv']], axis=1)
    p['bqkv'] = jnp.concatenate([params['bq'], params['bk'], params['bv']], axis=1)
    return p


def transformer_block(x, params, num_heads, *,
                      block_q=256, block_kv=512, block_seq=256,
                      block_ff=512, block_proj=512, vmem_limit_bytes=None):
    B, S, D = x.shape
    assert D % num_heads == 0, "d_model must be divisible by num_heads"
    d_k = D // num_heads
    d_ff = params['w1'].shape[1]
    cdt = x.dtype

    if vmem_limit_bytes is None:
        vmem_limit_bytes = _default_vmem_limit_bytes()

    ts = min(block_seq, S)
    tq = min(block_q, S)
    tk = min(block_kv, S)
    tf = min(block_ff, d_ff)
    tn = min(block_proj, D)          # QKV output-column tile; each tile is fully q, k or v
    assert S % ts == 0 and S % tq == 0 and S % tk == 0
    assert d_ff % tf == 0 and D % tn == 0

    # bf16 exp on bf16 models (v6e/v7x EUP fast path); f32 otherwise.
    exp_dtype = jnp.bfloat16 if cdt == jnp.bfloat16 else jnp.float32

    if 'wqkv' in params:
        wqkv, bqkv = params['wqkv'], params['bqkv']
    else:  # prefer prepare_params() so this concat is not paid on every forward.
        wqkv = jnp.concatenate([params['wq'], params['wk'], params['wv']], axis=1)
        bqkv = jnp.concatenate([params['bq'], params['bk'], params['bv']], axis=1)

    # ---- 1) fused QKV projection (column-tiled weight) ----------------------
    qkv = pl.pallas_call(
        functools.partial(_qkv_proj_kernel, scale=1.0 / float(d_k) ** 0.5,
                          d_model=D, block_cols=tn),
        out_shape=jax.ShapeDtypeStruct((B, S, 3 * D), cdt),
        grid_spec=pltpu.PrefetchScalarGridSpec(
            num_scalar_prefetch=0,
            grid=(B, S // ts, (3 * D) // tn),
            in_specs=[
                pl.BlockSpec((1, ts, D), lambda b, i, n: (b, i, 0)),
                pl.BlockSpec((D, tn), lambda b, i, n: (0, n)),
                pl.BlockSpec((1, tn), lambda b, i, n: (0, n)),
            ],
            out_specs=pl.BlockSpec((1, ts, tn), lambda b, i, n: (b, i, n)),
        ),
        compiler_params=pltpu.CompilerParams(
            dimension_semantics=("parallel", "parallel", "parallel"),
            vmem_limit_bytes=vmem_limit_bytes),
    )(x, wqkv, bqkv)

    # ---- 2) head-batched flash attention ------------------------------------
    # q / k / v are read directly out of `qkv` via the column block index
    # (0 -> q, 1 -> k, 2 -> v): no wrapper-side head split/merge transposes.
    ctx = pl.pallas_call(
        functools.partial(_flash_attn_kernel, num_heads=num_heads, d_k=d_k,
                          exp_dtype=exp_dtype),
        out_shape=jax.ShapeDtypeStruct((B, S, D), cdt),
        grid_spec=pltpu.PrefetchScalarGridSpec(
            num_scalar_prefetch=0,
            grid=(B, S // tq, S // tk),
            in_specs=[
                pl.BlockSpec((1, tq, D), lambda b, i, j: (b, i, 0)),   # q slab
                pl.BlockSpec((1, tk, D), lambda b, i, j: (b, j, 1)),   # k slab
                pl.BlockSpec((1, tk, D), lambda b, i, j: (b, j, 2)),   # v slab
            ],
            out_specs=pl.BlockSpec((1, tq, D), lambda b, i, j: (b, i, 0)),
            scratch_shapes=[
                pltpu.VMEM((num_heads, tq, 1), jnp.float32),     # running max  m
                pltpu.VMEM((num_heads, tq, 1), jnp.float32),     # running sum  l
                pltpu.VMEM((num_heads, tq, d_k), jnp.float32),   # output accumulator
            ],
        ),
        compiler_params=pltpu.CompilerParams(
            dimension_semantics=("parallel", "parallel", "arbitrary"),
            vmem_limit_bytes=vmem_limit_bytes),
    )(qkv, qkv, qkv)

    # ---- 3) out-proj + LN1 + FFN + LN2 ---------------------------------------
    return pl.pallas_call(
        _post_attn_kernel,
        out_shape=jax.ShapeDtypeStruct((B, S, D), cdt),
        grid_spec=pltpu.PrefetchScalarGridSpec(
            num_scalar_prefetch=0,
            grid=(B, S // ts, d_ff // tf),
            in_specs=[
                pl.BlockSpec((1, ts, D), lambda b, i, j: (b, i, 0)),   # ctx
                pl.BlockSpec((1, ts, D), lambda b, i, j: (b, i, 0)),   # x (residual)
                pl.BlockSpec((D, D), lambda b, i, j: (0, 0)),          # wo
                pl.BlockSpec((1, D), lambda b, i, j: (0, 0)),          # bo
                pl.BlockSpec((1, D), lambda b, i, j: (0, 0)),          # g1
                pl.BlockSpec((1, D), lambda b, i, j: (0, 0)),          # be1
                pl.BlockSpec((D, tf), lambda b, i, j: (0, j)),         # w1 tile
                pl.BlockSpec((1, tf), lambda b, i, j: (0, j)),         # b1 tile
                pl.BlockSpec((tf, D), lambda b, i, j: (j, 0)),         # w2 tile
                pl.BlockSpec((1, D), lambda b, i, j: (0, 0)),          # b2
                pl.BlockSpec((1, D), lambda b, i, j: (0, 0)),          # g2
                pl.BlockSpec((1, D), lambda b, i, j: (0, 0)),          # be2
            ],
            out_specs=pl.BlockSpec((1, ts, D), lambda b, i, j: (b, i, 0)),
            scratch_shapes=[
                pltpu.VMEM((ts, D), jnp.float32),   # h (post-LN1), f32
                pltpu.VMEM((ts, D), cdt),           # h in compute dtype (cast once)
                pltpu.VMEM((ts, D), jnp.float32),   # FFN accumulator
            ],
        ),
        compiler_params=pltpu.CompilerParams(
            dimension_semantics=("parallel", "parallel", "arbitrary"),
            vmem_limit_bytes=vmem_limit_bytes),
    )(ctx, x,
      params['wo'], params['bo'], params['g1'], params['be1'],
      params['w1'], params['b1'], params['w2'], params['b2'],
      params['g2'], params['be2'])


# ---------------------------------------------------------------------------
# Pure-JAX reference (eval-mode dropout), same math as the PyTorch module.
# ---------------------------------------------------------------------------
def _reference(x, params, num_heads):
    B, S, D = x.shape
    d_k = D // num_heads

    def lin(a, w, b):
        return a @ w + b

    q = lin(x, params['wq'], params['bq']).reshape(B, S, num_heads, d_k).transpose(0, 2, 1, 3)
    k = lin(x, params['wk'], params['bk']).reshape(B, S, num_heads, d_k).transpose(0, 2, 1, 3)
    v = lin(x, params['wv'], params['bv']).reshape(B, S, num_heads, d_k).transpose(0, 2, 1, 3)
    scores = jnp.einsum('bhqd,bhkd->bhqk', q, k) / jnp.sqrt(jnp.float32(d_k))
    attn = jax.nn.softmax(scores, axis=-1)
    ctx = jnp.einsum('bhqk,bhkd->bhqd', attn, v).transpose(0, 2, 1, 3).reshape(B, S, D)
    attn_out = lin(ctx, params['wo'], params['bo'])

    def ln(a, g, b, eps=_LN_EPS):
        mu = jnp.mean(a, axis=-1, keepdims=True)
        var = jnp.mean((a - mu) ** 2, axis=-1, keepdims=True)
        return (a - mu) * jax.lax.rsqrt(var + eps) * g + b

    h = ln(x + attn_out, params['g1'], params['be1'])
    f = jax.nn.gelu(lin(h, params['w1'], params['b1']), approximate=False)
    f = lin(f, params['w2'], params['b2'])
    return ln(h + f, params['g2'], params['be2'])


if __name__ == "__main__":
    # Small but TPU-tile-aligned shapes; S and d_ff sized so the multi-tile
    # (online-softmax / d_ff-reduction) code paths are exercised below.
    B, S, D, H, D_FF = 2, 256, 128, 4, 1024

    key = jax.random.PRNGKey(0)
    ks = jax.random.split(key, 17)

    def w(kk, shape, scale=0.1):
        return (scale * jax.random.normal(kk, shape)).astype(jnp.float32)

    params = {
        # attention projections in (in, out) layout + biases as (1, out)
        'wq': w(ks[0], (D, D)), 'bq': w(ks[1], (1, D)),
        'wk': w(ks[2], (D, D)), 'bk': w(ks[3], (1, D)),
        'wv': w(ks[4], (D, D)), 'bv': w(ks[5], (1, D)),
        'wo': w(ks[6], (D, D)), 'bo': w(ks[7], (1, D)),
        # LayerNorm1
        'g1': (1.0 + w(ks[8], (1, D), 0.05)).astype(jnp.float32),
        'be1': w(ks[9], (1, D), 0.05),
        # feed-forward
        'w1': w(ks[10], (D, D_FF)), 'b1': w(ks[11], (1, D_FF)),
        'w2': w(ks[12], (D_FF, D)), 'b2': w(ks[13], (1, D)),
        # LayerNorm2
        'g2': (1.0 + w(ks[14], (1, D), 0.05)).astype(jnp.float32),
        'be2': w(ks[15], (1, D), 0.05),
    }
    params = prepare_params(params)          # fuse QKV weights once, outside the forward
    x = jax.random.normal(ks[16], (B, S, D), dtype=jnp.float32)

    ref = _reference(x, params, num_heads=H)

    # f32 run with small explicit tiles: exercises multi-kv-tile online softmax,
    # multi-q-tile, and multi-d_ff-tile reduction paths.
    out = jax.block_until_ready(
        transformer_block(x, params, num_heads=H,
                          block_q=128, block_kv=128, block_seq=128, block_ff=256))
    assert out.shape == (B, S, D)
    err = float(jnp.max(jnp.abs(out - ref)))
    assert jnp.allclose(out, ref, atol=2e-3, rtol=2e-3), f"max abs err {err}"

    # bf16 fast path with the default (large) tiles: bf16 MXU operands + bf16 exp,
    # f32 accumulation / softmax statistics / LayerNorm statistics.
    bf16 = lambda t: t.astype(jnp.bfloat16)
    params_bf16 = jax.tree_util.tree_map(bf16, params)
    out_bf16 = jax.block_until_ready(
        transformer_block(bf16(x), params_bf16, num_heads=H))
    assert out_bf16.dtype == jnp.bfloat16
    assert jnp.allclose(out_bf16.astype(jnp.float32), ref, atol=1e-1, rtol=1e-1)

    print("KERNEL_OK")
</pallas_src>

<mosaic_0001>
module attributes {stable_mosaic.version = 11 : i64} {
  func.func @_qkv_proj_kernel(%arg0: i32, %arg1: i32, %arg2: i32, %arg3: memref<1x128x128xf32, #tpu.memory_space<vmem>>, %arg4: memref<128x128xf32, #tpu.memory_space<vmem>>, %arg5: memref<1x128xf32, #tpu.memory_space<vmem>>, %arg6: memref<1x128x128xf32, #tpu.memory_space<vmem>>) attributes {dimension_semantics = [#tpu.dimension_semantics<parallel>, #tpu.dimension_semantics<parallel>, #tpu.dimension_semantics<parallel>], iteration_bounds = array<i64: 2, 2, 3>, scalar_prefetch = 0 : i64, scratch_operands = 0 : i64, tpu.core_type = #tpu.core_type<tc>, window_params = [{transform_indices = @transform_0, window_bounds = array<i64: 1, 128, 128>}, {transform_indices = @transform_1, window_bounds = array<i64: 128, 128>}, {transform_indices = @transform_2, window_bounds = array<i64: 1, 128>}, {transform_indices = @transform_3, window_bounds = array<i64: 1, 128, 128>}]} {
    %c128_i32 = arith.constant 128 : i32
    %0 = arith.muli %arg2, %c128_i32 : i32
    %c0 = arith.constant 0 : index
    %c0_0 = arith.constant 0 : index
    %c0_1 = arith.constant 0 : index
    %1 = vector.load %arg3[%c0, %c0_0, %c0_1] : memref<1x128x128xf32, #tpu.memory_space<vmem>>, vector<1x128x128xf32>
    %2 = vector.shape_cast %1 : vector<1x128x128xf32> to vector<128x128xf32>
    %c0_2 = arith.constant 0 : index
    %c0_3 = arith.constant 0 : index
    %3 = vector.load %arg4[%c0_2, %c0_3] : memref<128x128xf32, #tpu.memory_space<vmem>>, vector<128x128xf32>
    %cst = arith.constant dense<0.000000e+00> : vector<128x128xf32>
    %4 = tpu.matmul %2, %3, %cst {dimension_numbers = #tpu.dot_dimension_numbers<[1], [0], [0], [1], [0, 0, 1, 1], [], []>} : vector<128x128xf32>, vector<128x128xf32>, vector<128x128xf32> -> vector<128x128xf32>
    %c0_4 = arith.constant 0 : index
    %c0_5 = arith.constant 0 : index
    %5 = vector.load %arg5[%c0_4, %c0_5] : memref<1x128xf32, #tpu.memory_space<vmem>>, vector<1x128xf32>
    %6 = vector.broadcast %5 : vector<1x128xf32> to vector<128x128xf32>
    %7 = arith.addf %4, %6 : vector<128x128xf32>
    %c128_i32_6 = arith.constant 128 : i32
    %8 = arith.cmpi slt, %0, %c128_i32_6 : i32
    %cst_7 = arith.constant 0.176776692 : f32
    %cst_8 = arith.constant 1.000000e+00 : f32
    %9 = arith.select %8, %cst_7, %cst_8 : f32
    %10 = vector.broadcast %9 : f32 to vector<128x128xf32>
    %11 = arith.mulf %7, %10 : vector<128x128xf32>
    %c0_9 = arith.constant 0 : index
    %c0_10 = arith.constant 0 : index
    %c0_11 = arith.constant 0 : index
    %12 = vector.load %arg6[%c0_9, %c0_10, %c0_11] : memref<1x128x128xf32, #tpu.memory_space<vmem>>, vector<1x128x128xf32>
    %13 = vector.shape_cast %12 : vector<1x128x128xf32> to vector<128x128xf32>
    %14 = vector.shape_cast %11 : vector<128x128xf32> to vector<1x128x128xf32>
    tpu.vector_store %arg6[%c0_9, %c0_10, %c0_11], %14 {strides = array<i32>} : memref<1x128x128xf32, #tpu.memory_space<vmem>>, vector<1x128x128xf32>,
    return
  }
  func.func @transform_0(%arg0: i32, %arg1: i32, %arg2: i32) -> (i32, i32, i32) {
    %c0_i32 = arith.constant 0 : i32
    %c0_i32_0 = arith.constant 0 : i32
    return %arg0, %arg1, %c0_i32 : i32, i32, i32
  }
  func.func @transform_1(%arg0: i32, %arg1: i32, %arg2: i32) -> (i32, i32) {
    %c0_i32 = arith.constant 0 : i32
    %c0_i32_0 = arith.constant 0 : i32
    return %c0_i32, %arg2 : i32, i32
  }
  func.func @transform_2(%arg0: i32, %arg1: i32, %arg2: i32) -> (i32, i32) {
    %c0_i32 = arith.constant 0 : i32
    %c0_i32_0 = arith.constant 0 : i32
    return %c0_i32, %arg2 : i32, i32
  }
  func.func @transform_3(%arg0: i32, %arg1: i32, %arg2: i32) -> (i32, i32, i32) {
    %c0_i32 = arith.constant 0 : i32
    return %arg0, %arg1, %arg2 : i32, i32, i32
  }
}

</mosaic_0001>

<bundles_post_ra>
// kernel: tpu_custom_call.1
= control target key start
LH: loop header
LB: loop body
LE: loop exit
PB: predicated region body
PF: predicated region fallthrough
CT: control target
= control target key end

     0   :  { %s1689_s0 = inlined_call_operand.hbm [shape: f32[2,256,128], index: 0, kind: input, shape index: {}]   ;;  %s1690_s1 = inlined_call_operand.hbm [shape: f32[128,384], index: 1, kind: input, shape index: {}]   ;;  %s1691_s2 = inlined_call_operand.vmem [shape: f32[1,384], index: 2, kind: input, shape index: {}]   ;;  %s1692_s3 = inlined_call_operand.hbm [shape: f32[2,256,384], index: 3, kind: output, shape index: {}]  }
   0x1   :  { %1708 = sst [smem:[#allocation20_spill]] %s1689_s0 }
   0x2   :  { %1709 = sst [smem:[#allocation21_spill]] %s1691_s2 }
   0x3   :  { %1710 = sst [smem:[#allocation22_spill]] %s1692_s3 }
   0x4   :  { %8 = vsyncpa [#allocation3], 0 }
   0x5   :  { %10 = vsyncpa [#allocation3 + $0x1], 0 }
   0x6   :  { %11 = vsyncpa [#allocation6], 0 }
   0x7   :  { %13 = vsyncpa [#allocation6 + $0x1], 0 }
   0x8   :  { %14 = vsyncpa [#allocation4], 0 }
   0x9   :  { %16 = vsyncpa [#allocation4 + $0x1], 0  ;;  %s1208_s12 = smov 0   ;;  %s1210_s13 = smov 0  }
   0xa   :  { %s1212_s14 = smov 0   ;;  %s1214_s15 = smov 0  }
   0xb   :  { %s1216_s16 = smov 0   ;;  %s1218_s17 = smov 0  }
   0xc   :  { %s1220_s18 = smov 0   ;;  %s1222_s19 = smov 0  }
   0xd   :  { %s1224_s20 = smov 0   ;;  %s1226_s21 = smov 0  }
   0xe   :  { %s1228_s22 = smov 0   ;;  %s1230_s23 = smov 0  }
   0xf   :  { %s1232_s24 = smov 0   ;;  %s1234_s25 = smov 0  }
  0x10   :  { %s1236_s26 = smov 0   ;;  %s1238_s27 = smov 0  }
  0x11 LB: > { %1711 = sst [smem:[#allocation11_spill]] %s1117_s12  ;;  %s638_s28 = sadd.s32 4294967295, %s1177_s27   ;;  %s1177_s27 = sphi %s1238_s27, %s22_s27   ;;  %s1173_s26 = sphi %s1236_s26, %s1767_s26   ;;  %s1169_s25 = sphi %s1234_s25, %s1755_s25   ;;  %s1165_s24 = sphi %s1232_s24, %s1766_s24   ;;  %s1161_s23 = sphi %s1230_s23, %s1765_s23   ;;  %s1157_s22 = sphi %s1228_s22, %s1753_s22   ;;  %s1153_s21 = sphi %s1226_s21, %s1764_s21   ;;  %s1149_s20 = sphi %s1224_s20, %s1763_s20   ;;  %s1145_s19 = sphi %s1222_s19, %s1762_s19   ;;  %s1141_s18 = sphi %s1220_s18, %s1761_s18   ;;  %s1137_s17 = sphi %s1218_s17, %s1752_s17   ;;  %s1133_s16 = sphi %s1216_s16, %s1760_s16   ;;  %s1129_s15 = sphi %s1214_s15, %s1759_s15   ;;  %s1125_s14 = sphi %s1212_s14, %s1758_s14   ;;  %s1121_s13 = sphi %s1210_s13, %s1757_s13   ;;  %s1117_s12 = sphi %s1208_s12, %s1756_s12  }
  0x12   : > { %1712 = sst [smem:[#allocation12_spill]] %s1137_s17  ;;  %p57_p0 = scmp.ne.s32.totalorder %s1149_s20, %s1145_s19 }
  0x13   : > { %1713 = sst [smem:[#allocation13_spill]] %s1157_s22  ;;  %p1695_p1 = scmp.eq.s32.totalorder %s1177_s27, 0 }
  0x14   : > { %1714 = sst [smem:[#allocation14_spill]] %s1161_s23  ;;  %p63_p2 = scmp.ne.s32.totalorder %s1145_s19, %s1141_s18 }
  0x15   : > { %1715 = sst [smem:[#allocation15_spill]] %s1169_s25  ;;  %p1294_p3 = scmp.eq.s32.totalorder %s638_s28, 0 }
  0x16   : > { %p1300_p4 = por %p1695_p1, %p57_p0  ;;  %p1304_p5 = scmp.eq.s32.totalorder %s638_s28, 11 }
  0x17   : > { %p1310_p6 = por %p1294_p3, %p63_p2  ;;  %p1694_p7 = scmp.lt.s32.totalorder %s1177_s27, 12 }
  0x18   : > { %s1718_s7 = scalar_select %p1304_p5, 1, 0 }
  0x19   : > { %s1719_s8 = scalar_select %p1310_p6, 1, 0 }
  0x1a   : > { %s169_s9 = sand.u32 1, %s1149_s20   ;;  %s643_s11 = sshll.u32 %s1169_s25, 4 }
  0x1b   : > { %s642_s10 = sshll.u32 %s169_s9, 7  ;;  %s644_s18 = sshll.u32 %s1173_s26, 5 }
  0x1c   : > { %s173_s4 = scalar_lea.vmem [#allocation2], %s642_s10  ;;  %s179_s29 = sadd.s32 %s644_s18, %s643_s11 }
  0x1d   : > { %s182_s30 = sshll.u32 %s173_s4, 4  ;;  %s645_s3 = sshll.u32 %s179_s29, 7  ;;  %s1318_s30 = int_to_ptr.vmem [resolvable:$true] %s182_s30 }
  0x1e   : > { %p1324_p8 = pnand %p1694_p7, %p1300_p4  ;;  %s1721_s0 = sld [smem:[#allocation20_spill]] }
  0x1f   : > { %s1333_s4 = scalar_lea.sflag [#allocation3], %s169_s9 }
  0x20   : > { %p953_p10 = pneg %p1324_p8 }
  0x24   : > { %s1331_s22 = scalar_lea.hbm %s1721_s0, %s645_s3  ;;  %s956_s23 = scalar_lea.hbm %s1721_s0, 8192 }
  0x25   : > { %s951_s29 = scalar_lea.hbm %s1331_s22, 2048  ;;  %p957_p13 = scmp.lt.u32.totalorder %s1331_s22, %s1721_s0 }
  0x26   : > { %p952_p9 = scmp.ne.s32.totalorder %s1331_s22, %s951_s29  ;;  %p958_p0 = scmp.lt.u32.totalorder %s956_s23, %s951_s29 }
  0x27   : > { %p960_p4 = scmp.lt.u32.totalorder %s951_s29, %s1331_s22 }
  0x28   : > { %p954_p11 = pnand %p953_p10, %p952_p9  ;;  %p959_p2 = por %p958_p0, %p957_p13 }
  0x2a   : > { %p955_p12 = pneg %p954_p11  ;;  %p961_p7 = por %p960_p4, %p959_p2 }
  0x2c   : > { %p962_p1 = pnand %p961_p7, %p955_p12 }
  0x2e   : > { %965 = shalt.err (!%p962_p1)
}
  0x2f   : > { %s966_s9 = scalar_lea.vmem %s1318_s30, 2048  ;;  %s1179_s11 = smov [#allocation2]  }
  0x30   : > { %p967_p9 = scmp.ne.s32.totalorder %s1318_s30, %s966_s9  ;;  %s971_s18 = sshll.u32 %s1179_s11, 4  ;;  %s972_s18 = int_to_ptr.vmem [resolvable:$false] %s971_s18 }
  0x31   : > { %s973_s6 = scalar_lea.vmem %s972_s18, 4096  ;;  %p974_p5 = scmp.lt.s32.totalorder %s1318_s30, %s972_s18 }
  0x32   : > { %p969_p11 = pnand %p967_p9, %p953_p10  ;;  %p975_p13 = scmp.lt.s32.totalorder %s973_s6, %s966_s9 }
  0x34   : > { %p970_p6 = pneg %p969_p11  ;;  %p976_p0 = por %p975_p13, %p974_p5 }
  0x36   : > { %p977_p2 = pnand %p976_p0, %p970_p6 }
  0x38   : > { %980 = shalt.err (!%p977_p2)
}
  0x39   : > { %s1697_s29 = smov 128   ;;  %s1698_s2 = smov 8  }
  0x3a   : > { %807 = dma.hbm_to_vmem [thread:$0]  (!%p1324_p8), %s1331_s22, 2048, %s1318_s30, %s1333_s4, %s1697_s29, %s1697_s29, %s1698_s2  }
  0x3b   : > { %p648_p1 = scmp.ge.s32.totalorder %s1177_s27, 1  ;;  %p216_p5 = scmp.lt.s32.totalorder %s1177_s27, 13 }
  0x3c   : > { %s639_s3 = sadd.s32 4294967294, %s1177_s27   ;;  %s34_s10 = sadd.s32 1, %s1165_s24 }
  0x3d   : > { %p1366_p6 = pnand %p648_p1, %p216_p5  ;;  %s76_s9 = sadd.s32 1, %s1137_s17 }
  0x3e   : > { %p35_p7 = scmp.ge.s32.totalorder %s34_s10, 3  ;;  %p83_p10 = scmp.ne.s32.totalorder %s1137_s17, %s1133_s16 }
  0x3f   : > { %p89_p8 = scmp.ne.s32.totalorder %s1133_s16, %s1129_s15  ;;  %s132_s22 = sadd.s32 1, %s1125_s14 }
  0x40   : > { %s1769_s10 = smov (%p35_p7, %s34_s10), 0  ;;  %s1724_s30 = sadd.s32 1, %s1169_s25 }
  0x41   : > { %1723 = sst [smem:[#allocation16_spill]] %s1769_s10  ;;  %s1771_s30 = smov (!%p35_p7, %s1724_s30), %s1169_s25 }
  0x42   : > { %s73_s28 = ssub.s32 %s1165_s24, %s1769_s10  ;;  %p1725_p12 = scmp.eq.s32.totalorder %s1177_s27, 0 }
  0x43   : > { %p39_p9 = scmp.ge.s32.totalorder %s1771_s30, 2  ;;  %p74_p11 = scmp.eq.s32.totalorder %s73_s28, 0 }
  0x44   : > { %p1387_p4 = por %p83_p10, %p1725_p12  ;;  %p1393_p13 = por %p89_p8, %p1294_p3 }
  0x45   : > { %p142_p0 = scmp.ne.s32.totalorder %s1125_s14, %s1121_s13  ;;  %s1773_s30 = smov (%p39_p9, %s1771_s30), 0 }
  0x46   : > { %s1727_s15 = scalar_select %p1393_p13, 1, 0 }
  0x47   : > { %1728 = sst [smem:[#allocation17_spill]] %s1773_s30  ;;  %s1729_s11 = sadd.s32 1, %s1173_s26 }
  0x48   : > { %s1775_s11 = smov (!%p39_p9, %s1729_s11), %s1173_s26  ;;  %s46_s18 = ssub.s32 %s1169_s25, %s1773_s30 }
  0x49   : > { %p1730_p2 = scmp.ne.s32.totalorder %s1718_s7, 0  ;;  %p43_p3 = scmp.ge.s32.totalorder %s1775_s11, 2 }
  0x4a   : > { %p148_p5 = scmp.ne.s32.totalorder %s1121_s13, %s1117_s12  ;;  %p149_p7 = scmp.eq.s32.totalorder %s639_s3, 11 }
  0x4b   : > { %p1408_p1 = por %p1730_p2, %p142_p0  ;;  %s1777_s11 = smov (%p43_p3, %s1775_s11), 0 }
  0x4c   : > { %s1415_s5 = scalar_select %p74_p11, %s1137_s17, %s76_s9  }
  0x4d   : > { %s1731_s6 = scalar_select %p1408_p1, 1, 0 }
  0x4e   : > { %1733 = sst [smem:[#allocation19_spill]] %s1415_s5  ;;  %s192_s29 = sand.u32 1, %s1137_s17  }
  0x4f   : > { %1732 = sst [smem:[#allocation18_spill]] %s1731_s6  ;;  %s45_s2 = ssub.s32 %s1173_s26, %s1777_s11 }
  0x50   : > { %s47_s0 = sor.u32 %s46_s18, %s45_s2  ;;  %p1422_p10 = por %p149_p7, %p148_p5 }
  0x51   : > { %p48_p8 = scmp.eq.s32.totalorder %s47_s0, 0  ;;  %s129_s30 = sor.u32 %s73_s28, %s47_s0 }
  0x52   : > { %s1734_s7 = scalar_select %p1422_p10, 1, 0 }
  0x53   : > { %p130_p12 = scmp.eq.s32.totalorder %s129_s30, 0  ;;  %s646_s10 = sshll.u32 %s192_s29, 7 }
  0x54   : > { %s1735_s25 = sadd.s32 1, %s1149_s20  ;;  %s647_s12 = sshll.u32 %s1165_s24, 7 }
  0x55   : > { %s1429_s9 = scalar_select %p48_p8, %s1149_s20, %s1735_s25  }
  0x56   : > { %s1432_s5 = scalar_select %p130_p12, %s1125_s14, %s132_s22  }
  0x57   : > { %s1438_s17 = scalar_lea.hbm %s1690_s1, %s647_s12  ;;  %s196_s2 = scalar_lea.vmem [#allocation5], %s646_s10 }
  0x58   : > { %s202_s18 = sshll.u32 %s196_s2, 4  ;;  %p1736_p9 = scmp.lt.s32.totalorder %s1177_s27, 12  ;;  %s1440_s18 = int_to_ptr.vmem [resolvable:$true] %s202_s18 }
  0x59   : > { %s1450_s25 = scalar_lea.sflag [#allocation6], %s192_s29  ;;  %s981_s12 = scalar_lea.hbm %s1438_s17, 2048 }
  0x5a   : > { %p1446_p11 = pnand %p1736_p9, %p1387_p4  ;;  %p982_p0 = scmp.ne.s32.totalorder %s1438_s17, %s981_s12 }
  0x5b   : > { %s986_s30 = scalar_lea.hbm %s1690_s1, 6144  ;;  %p987_p4 = scmp.lt.u32.totalorder %s1438_s17, %s1690_s1 }
  0x5c   : > { %p983_p2 = pneg %p1446_p11  ;;  %p988_p7 = scmp.lt.u32.totalorder %s986_s30, %s981_s12 }
  0x5d   : > { %p990_p12 = scmp.lt.u32.totalorder %s981_s12, %s1438_s17 }
  0x5e   : > { %p984_p3 = pnand %p983_p2, %p982_p0  ;;  %p989_p8 = por %p988_p7, %p987_p4 }
  0x60   : > { %p985_p5 = pneg %p984_p3  ;;  %p991_p9 = por %p990_p12, %p989_p8 }
  0x62   : > { %p992_p10 = pnand %p991_p9, %p985_p5 }
  0x64   : > { %995 = shalt.err (!%p992_p10)
}
  0x65   : > { %s996_s29 = scalar_lea.vmem %s1440_s18, 2048  ;;  %s1182_s6 = smov [#allocation5]  }
  0x66   : > { %p997_p0 = scmp.ne.s32.totalorder %s1440_s18, %s996_s29  ;;  %s1001_s3 = sshll.u32 %s1182_s6, 4  ;;  %s1002_s3 = int_to_ptr.vmem [resolvable:$false] %s1001_s3 }
  0x67   : > { %s1003_s2 = scalar_lea.vmem %s1002_s3, 4096  ;;  %p1004_p13 = scmp.lt.s32.totalorder %s1440_s18, %s1002_s3 }
  0x68   : > { %p999_p3 = pnand %p997_p0, %p983_p2  ;;  %p1005_p4 = scmp.lt.s32.totalorder %s1003_s2, %s996_s29 }
  0x6a   : > { %p1000_p1 = pneg %p999_p3  ;;  %p1006_p7 = por %p1005_p4, %p1004_p13 }
  0x6c   : > { %p1007_p8 = pnand %p1006_p7, %p1000_p1 }
  0x6e   : > { %1010 = shalt.err (!%p1007_p8)
}
  0x6f   : > { %s1183_s12 = smov 384   ;;  %s1738_s10 = smov 8  }
  0x70   : > { %s1739_s22 = smov 128   ;;  %220 = sbr.rel (%p1366_p6) target bundleno = 404 (0x194), region = 32 }
  0x71   : > { %810 = dma.hbm_to_vmem [thread:$0]  (!%p1446_p11), %s1438_s17, 2048, %s1440_s18, %s1450_s25, %s1183_s12, %s1739_s22, %s1738_s10  }
  0x72   : > { %s222_s30 = sand.u32 (!%p1366_p6), 1, %s1145_s19   ;;  %p1740_p13 = scmp.ne.s32.totalorder (!%p1366_p6), %s1719_s8, 0 }
  0x73   : > { %s649_s28 = sshll.u32 (!%p1366_p6), %s222_s30, 7  ;;  %s223_s4 = scalar_lea.sflag (!%p1366_p6), [#allocation3], %s222_s30 }
  0x74   : > { %s1483_s29 = scalar_lea.vmem (!%p1366_p6), [#allocation2], %s649_s28 }
  0x77   : > { %1104 = dma.done.wait (%p1740_p13), %s223_s4, 2048  }
  0x78   : > { %1106 = vsyncadd (%p1740_p13), %s223_s4, 4294965248  ;;  %s231_s0 = sand.u32 1, %s1133_s16   ;;  %p1741_p6 = scmp.ne.s32.totalorder %s1727_s15, 0 }
  0x79   : > { %s650_s6 = sshll.u32 %s231_s0, 7  ;;  %s232_s17 = scalar_lea.sflag [#allocation6], %s231_s0 }
  0x7a   : > { %s1490_s18 = scalar_lea.vmem [#allocation5], %s650_s6 }
  0x7b   : > { %1108 = dma.done.wait (%p1741_p6), %s232_s17, 2048  }
  0x7c   : > { %1110 = vsyncadd (%p1741_p6), %s232_s17, 4294965248  ;;  %v288_v0 = vld [vmem:[%s1490_s18] sm:$0xff]  ;;  %v289_v1 = vld [vmem:[%s1490_s18 + $0x8] sm:$0xff]  ;;  %p267_p1 = scmp.lt.s32.totalorder %s1153_s21, 2  ;;  %s1742_s8 = sld [smem:[#allocation13_spill]] }
  0x7d   : > { %v290_v2 = vld [vmem:[%s1490_s18 + $0x10] sm:$0xff]  ;;  %v748_v3 = vpack.c.bf16 %v289_v1, %v288_v0  ;;  %v291_v4 = vld [vmem:[%s1490_s18 + $0x18] sm:$0xff]  ;;  %v292_v6 = vld [vmem:[%s1490_s18 + $0x20] sm:$0xff]  ;;  %s652_s23 = sshll.u32 %s1153_s21, 7  ;;  %s263_s25 = sand.u32 1, %s1121_s13  }
  0x7e   : > { %v752_v5 = vpack.c.bf16 %v291_v4, %v290_v2  ;;  %v293_v7 = vld [vmem:[%s1490_s18 + $0x28] sm:$0xff]  ;;  %v272_v9 = vld [vmem:[%s1483_s29] sm:$0xff]  ;;  %v294_v11 = vld [vmem:[%s1490_s18 + $0x30] sm:$0xff]  ;;  %s268_s15 = scalar_select %p267_p1, %s1153_s21, 2 }
  0x7f   : > { %749 = vmatprep.subr.bf16.mxu0 %v748_v3  ;;  %780 = vmatprep.subr.bf16.mxu1 %v748_v3  ;;  %v756_v8 = vpack.c.bf16 %v293_v7, %v292_v6  ;;  %v280_v10 = vld [vmem:[%s1483_s29 + $0x40] sm:$0xff]  ;;  %v295_v12 = vld [vmem:[%s1490_s18 + $0x38] sm:$0xff]  ;;  %v297_v15 = vld [vmem:[%s1490_s18 + $0x48] sm:$0xff]  ;;  %p456_p10 = scmp.lt.s32.totalorder %s652_s23, 128  ;;  %s1743_s12 = sld [smem:[#allocation21_spill]] }
  0x80   : > { %751 = vmatpush3.bf16.msra.mxu0 %v748_v3  ;;  %788 = vmatpush3.bf16.msra.mxu1 %v748_v3  ;;  %v760_v13 = vpack.c.bf16 %v295_v12, %v294_v11  ;;  %v296_v14 = vld [vmem:[%s1490_s18 + $0x40] sm:$0xff]  ;;  %v298_v17 = vld [vmem:[%s1490_s18 + $0x50] sm:$0xff]  ;;  %v299_v18 = vld [vmem:[%s1490_s18 + $0x58] sm:$0xff]  ;;  %s651_s30 = sshll.u32 %s263_s25, 7  ;;  %s1744_s28 = sld [smem:[#allocation14_spill]] }
  0x81   : > { %753 = vmatprep.subr.bf16.mxu0 %v752_v5  ;;  %781 = vmatprep.subr.bf16.mxu1 %v752_v5  ;;  %v764_v16 = vpack.c.bf16 %v297_v15, %v296_v14  ;;  %v768_v19 = vpack.c.bf16 %v299_v18, %v298_v17  ;;  %v300_v20 = vld [vmem:[%s1490_s18 + $0x60] sm:$0xff]  ;;  %v301_v21 = vld [vmem:[%s1490_s18 + $0x68] sm:$0xff]  ;;  %v302_v23 = vld [vmem:[%s1490_s18 + $0x70] sm:$0xff]  ;;  %s457_s22 = scalar_select %p456_p10, 0.17677669, 1.0 }
  0x82   : > { %724 = vmatprep.mubr.f32.mxu0 %v272_v9  ;;  %736 = vmatprep.mubr.f32.mxu1 %v280_v10  ;;  %v772_v22 = vpack.c.bf16 %v301_v21, %v300_v20  ;;  %v303_v24 = vld [vmem:[%s1490_s18 + $0x78] sm:$0xff]  ;;  %v273_v26 = vld [vmem:[%s1483_s29 + $0x8] sm:$0xff]  ;;  %v274_v28 = vld [vmem:[%s1483_s29 + $0x10] sm:$0xff]  ;;  %s796_s4 = smul.u32 48, %s1742_s8  ;;  %s1551_s0 = scalar_lea.vmem [#allocation7], %s651_s30 }
  0x83   : > { %v776_v25 = vpack.c.bf16 %v303_v24, %v302_v23  ;;  %v281_v27 = vld [vmem:[%s1483_s29 + $0x48] sm:$0xff]  ;;  %v282_v29 = vld [vmem:[%s1483_s29 + $0x50] sm:$0xff]  ;;  %v275_v30 = vld [vmem:[%s1483_s29 + $0x18] sm:$0xff]  ;;  %v1539_v42 = vstv %s457_s22  ;;  %s509_s18 = sshll.u32 %s1551_s0, 4  ;;  %s1745_s8 = sld [smem:[#allocation18_spill]]  ;;  %s1597_s18 = int_to_ptr.vmem [resolvable:$true] %s509_s18 }
  0x84   : > { %755 = vmatpush3.bf16.msra.mxu0 %v752_v5  ;;  %789 = vmatpush3.bf16.msra.mxu1 %v752_v5  ;;  %v283_v31 = vld [vmem:[%s1483_s29 + $0x58] sm:$0xff]  ;;  %v276_v32 = vld [vmem:[%s1483_s29 + $0x20] sm:$0xff]  ;;  %v277_v34 = vld [vmem:[%s1483_s29 + $0x28] sm:$0xff]  ;;  %s504_s6 = sadd.s32 %s1153_s21, %s796_s4  ;;  %s1746_s3 = sld [smem:[#allocation22_spill]] }
  0x85   : > { %757 = vmatprep.subr.bf16.mxu0 %v756_v8  ;;  %782 = vmatprep.subr.bf16.mxu1 %v756_v8  ;;  %v284_v33 = vld [vmem:[%s1483_s29 + $0x60] sm:$0xff]  ;;  %v285_v35 = vld [vmem:[%s1483_s29 + $0x68] sm:$0xff]  ;;  %v278_v36 = vld [vmem:[%s1483_s29 + $0x30] sm:$0xff]  ;;  %s269_s10 = scalar_lea.vmem %s1743_s12, %s268_s15  ;;  %s1607_s12 = scalar_lea.sflag [#allocation4], %s263_s25 }
  0x86   : > { %v286_v37 = vld [vmem:[%s1483_s29 + $0x70] sm:$0xff]  ;;  %v279_v38 = vld [vmem:[%s1483_s29 + $0x38] sm:$0xff]  ;;  %v1535_v40 = vld [vmem:[%s269_s10] ss:$0 sm:$0xff]  ;;  %s1011_s10 = scalar_lea.vmem %s1597_s18, 2048  ;;  %s1184_s22 = smov [#allocation7]  }
  0x87   : > { %v287_v39 = vld [vmem:[%s1483_s29 + $0x78] sm:$0xff]  ;;  %s797_s29 = smul.u32 96, %s1744_s28  ;;  %p1012_p11 = scmp.ne.s32.totalorder %s1597_s18, %s1011_s10 }
  0x88   : > { %759 = vmatpush3.bf16.msra.mxu0 %v756_v8  ;;  %790 = vmatpush3.bf16.msra.mxu1 %v756_v8  ;;  %s1015_s30 = sshll.u32 %s1184_s22, 4  ;;  %s1016_s30 = int_to_ptr.vmem [resolvable:$false] %s1015_s30 }
  0x89   : > { %761 = vmatprep.subr.bf16.mxu0 %v760_v13  ;;  %783 = vmatprep.subr.bf16.mxu1 %v760_v13  ;;  %s1566_s17 = sadd.s32 %s797_s29, %s504_s6  ;;  %p1747_p2 = scmp.ne.s32.totalorder %s1745_s8, 0 }
  0x8a   : > { %s657_s21 = sshll.u32 %s1566_s17, 7  ;;  %s1017_s28 = scalar_lea.vmem %s1016_s30, 4096 }
  0x8b   : > { %s1593_s2 = scalar_lea.hbm %s1746_s3, %s657_s21  ;;  %p1013_p5 = pnand %p1012_p11, %p1747_p2 }
  0x8c   : > { %763 = vmatpush3.bf16.msra.mxu0 %v760_v13  ;;  %791 = vmatpush3.bf16.msra.mxu1 %v760_v13  ;;  %p1018_p9 = scmp.lt.s32.totalorder %s1597_s18, %s1016_s30  ;;  %p1019_p0 = scmp.lt.s32.totalorder %s1017_s28, %s1011_s10 }
  0x8d   : > { %765 = vmatprep.subr.bf16.mxu0 %v764_v16  ;;  %784 = vmatprep.subr.bf16.mxu1 %v764_v16  ;;  %p1014_p12 = pneg %p1013_p5 }
  0x8e   : > { %p1020_p3 = por %p1019_p0, %p1018_p9 }
  0x90   : > { %767 = vmatpush3.bf16.msra.mxu0 %v764_v16  ;;  %792 = vmatpush3.bf16.msra.mxu1 %v764_v16  ;;  %p1021_p4 = pnand %p1020_p3, %p1014_p12 }
  0x91   : > { %769 = vmatprep.subr.bf16.mxu0 %v768_v19  ;;  %785 = vmatprep.subr.bf16.mxu1 %v768_v19 }
  0x94   : > { %771 = vmatpush3.bf16.msra.mxu0 %v768_v19  ;;  %793 = vmatpush3.bf16.msra.mxu1 %v768_v19 }
  0x95   : > { %773 = vmatprep.subr.bf16.mxu0 %v772_v22  ;;  %786 = vmatprep.subr.bf16.mxu1 %v772_v22 }
  0x98   : > { %775 = vmatpush3.bf16.msra.mxu0 %v772_v22  ;;  %794 = vmatpush3.bf16.msra.mxu1 %v772_v22 }
  0x99   : > { %777 = vmatprep.subr.bf16.mxu0 %v776_v25  ;;  %787 = vmatprep.subr.bf16.mxu1 %v776_v25 }
  0x9c   : > { %779 = vmatpush3.bf16.msra.mxu0 %v776_v25  ;;  %795 = vmatpush3.bf16.msra.mxu1 %v776_v25 }
  0x9f   : > { %725 = vmatmul.mubr.f32.vlgmr.msra.gmra.mrb[0].mxu0 %v273_v26  ;;  %737 = vmatmul.mubr.f32.vlgmr.msra.gmra.mrb[0].mxu1 %v281_v27 }
  0xa0   : > { %727 = vmatprep.mubr.f32.mxu0 %v274_v28  ;;  %739 = vmatprep.mubr.f32.mxu1 %v282_v29 }
  0xa3   : > { %728 = vmatmul.mubr.f32.gmra.mrb[2].mxu0 %v275_v30  ;;  %740 = vmatmul.mubr.f32.gmra.mrb[2].mxu1 %v283_v31 }
  0xa4   : > { %730 = vmatprep.mubr.f32.mxu0 %v276_v32  ;;  %742 = vmatprep.mubr.f32.mxu1 %v284_v33 }
  0xa7   : > { %731 = vmatmul.mubr.f32.gmra.mrb[4].mxu0 %v277_v34  ;;  %743 = vmatmul.mubr.f32.gmra.mrb[4].mxu1 %v285_v35 }
  0xa8   : > { %733 = vmatprep.mubr.f32.mxu0 %v278_v36  ;;  %745 = vmatprep.mubr.f32.mxu1 %v286_v37 }
  0xab   : > { %734 = vmatmul.mubr.f32.gmra.mrb[6].mxu0 %v279_v38  ;;  %746 = vmatmul.mubr.f32.gmra.mrb[6].mxu1 %v287_v39 }
 0x172   : > { %v726_v41 = vpop.f32.mrb[0].mxu0  ;;  %v738_v43 = vpop.f32.mrb[0].mxu1 }
 0x173   : > { %v383_v44 = vadd.f32 %v726_v41, %v1535_v40  ;;  %v423_v45 = vadd.f32 %v738_v43, %v1535_v40  ;;  %v377_v46 = vpop.f32.mrb[1].mxu0  ;;  %v417_v47 = vpop.f32.mrb[1].mxu1 }
 0x174   : > { %v378_v48 = vadd.f32 %v1535_v40, %v377_v46  ;;  %v418_v49 = vadd.f32 %v1535_v40, %v417_v47 }
 0x175   : > { %v460_v50 = vmul.f32 %v1539_v42, %v383_v44  ;;  %v468_v51 = vmul.f32 %v1539_v42, %v423_v45 }
 0x176   : > { %v459_v52 = vmul.f32 %v1539_v42, %v378_v48  ;;  %v467_v53 = vmul.f32 %v1539_v42, %v418_v49  ;;  %v729_v54 = vpop.f32.mrb[2].mxu0  ;;  %v741_v55 = vpop.f32.mrb[2].mxu1 }
 0x177   : > { %476 = vst [vmem:[%s1551_s0 + $0x8] sm:$0xff] %v460_v50  ;;  %484 = vst [vmem:[%s1551_s0 + $0x48] sm:$0xff] %v468_v51  ;;  %v393_v56 = vadd.f32 %v729_v54, %v1535_v40  ;;  %v433_v57 = vadd.f32 %v741_v55, %v1535_v40  ;;  %v387_v58 = vpop.f32.mrb[3].mxu0  ;;  %v427_v59 = vpop.f32.mrb[3].mxu1 }
 0x178   : > { %475 = vst [vmem:[%s1551_s0] sm:$0xff] %v459_v52  ;;  %483 = vst [vmem:[%s1551_s0 + $0x40] sm:$0xff] %v467_v53  ;;  %v388_v60 = vadd.f32 %v1535_v40, %v387_v58  ;;  %v428_v61 = vadd.f32 %v1535_v40, %v427_v59 }
 0x179   : > { %v462_v62 = vmul.f32 %v1539_v42, %v393_v56  ;;  %v470_v63 = vmul.f32 %v1539_v42, %v433_v57 }
 0x17a   : > { %v461_v0 = vmul.f32 %v1539_v42, %v388_v60  ;;  %v469_v1 = vmul.f32 %v1539_v42, %v428_v61  ;;  %v732_v2 = vpop.f32.mrb[4].mxu0  ;;  %v744_v3 = vpop.f32.mrb[4].mxu1 }
 0x17b   : > { %478 = vst [vmem:[%s1551_s0 + $0x18] sm:$0xff] %v462_v62  ;;  %486 = vst [vmem:[%s1551_s0 + $0x58] sm:$0xff] %v470_v63  ;;  %v403_v4 = vadd.f32 %v732_v2, %v1535_v40  ;;  %v443_v5 = vadd.f32 %v744_v3, %v1535_v40  ;;  %v397_v6 = vpop.f32.mrb[5].mxu0  ;;  %v437_v7 = vpop.f32.mrb[5].mxu1 }
 0x17c   : > { %477 = vst [vmem:[%s1551_s0 + $0x10] sm:$0xff] %v461_v0  ;;  %485 = vst [vmem:[%s1551_s0 + $0x50] sm:$0xff] %v469_v1  ;;  %v398_v8 = vadd.f32 %v1535_v40, %v397_v6  ;;  %v438_v9 = vadd.f32 %v1535_v40, %v437_v7 }
 0x17d   : > { %v464_v10 = vmul.f32 %v1539_v42, %v403_v4  ;;  %v472_v11 = vmul.f32 %v1539_v42, %v443_v5 }
 0x17e   : > { %v463_v12 = vmul.f32 %v1539_v42, %v398_v8  ;;  %v471_v13 = vmul.f32 %v1539_v42, %v438_v9  ;;  %v735_v14 = vpop.f32.mrb[6].mxu0  ;;  %v747_v15 = vpop.f32.mrb[6].mxu1 }
 0x17f   : > { %480 = vst [vmem:[%s1551_s0 + $0x28] sm:$0xff] %v464_v10  ;;  %488 = vst [vmem:[%s1551_s0 + $0x68] sm:$0xff] %v472_v11  ;;  %v413_v16 = vadd.f32 %v735_v14, %v1535_v40  ;;  %v453_v17 = vadd.f32 %v747_v15, %v1535_v40  ;;  %v407_v18 = vpop.f32.mrb[7].mxu0  ;;  %v447_v19 = vpop.f32.mrb[7].mxu1 }
 0x180   : > { %479 = vst [vmem:[%s1551_s0 + $0x20] sm:$0xff] %v463_v12  ;;  %487 = vst [vmem:[%s1551_s0 + $0x60] sm:$0xff] %v471_v13  ;;  %v408_v20 = vadd.f32 %v1535_v40, %v407_v18  ;;  %v448_v21 = vadd.f32 %v1535_v40, %v447_v19 }
 0x181   : > { %v466_v22 = vmul.f32 %v1539_v42, %v413_v16  ;;  %v474_v23 = vmul.f32 %v1539_v42, %v453_v17 }
 0x182   : > { %v465_v24 = vmul.f32 %v1539_v42, %v408_v20  ;;  %v473_v25 = vmul.f32 %v1539_v42, %v448_v21 }
 0x183   : > { %482 = vst [vmem:[%s1551_s0 + $0x38] sm:$0xff] %v466_v22  ;;  %490 = vst [vmem:[%s1551_s0 + $0x78] sm:$0xff] %v474_v23 }
 0x184   : > { %481 = vst [vmem:[%s1551_s0 + $0x30] sm:$0xff] %v465_v24  ;;  %489 = vst [vmem:[%s1551_s0 + $0x70] sm:$0xff] %v473_v25 }
 0x185   : > { %1024 = shalt.err (!%p1021_p4)
}
 0x186   : > { %s1025_s25 = scalar_lea.hbm %s1593_s2, 2048  ;;  %s1029_s0 = scalar_lea.hbm %s1746_s3, 24576 }
 0x187   : > { %p1026_p7 = scmp.ne.s32.totalorder %s1593_s2, %s1025_s25  ;;  %p1030_p6 = scmp.lt.u32.totalorder %s1593_s2, %s1746_s3 }
 0x188   : > { %p1031_p1 = scmp.lt.u32.totalorder %s1029_s0, %s1025_s25  ;;  %p1033_p11 = scmp.lt.u32.totalorder %s1025_s25, %s1593_s2 }
 0x189   : > { %p1027_p8 = pnand %p1026_p7, %p1747_p2 }
 0x18a   : > { %p1032_p10 = por %p1031_p1, %p1030_p6 }
 0x18b   : > { %p1028_p13 = pneg %p1027_p8 }
 0x18c   : > { %p1034_p5 = por %p1033_p11, %p1032_p10 }
 0x18e   : > { %p1035_p12 = pnand %p1034_p5, %p1028_p13 }
 0x190   : > { %1038 = shalt.err (!%p1035_p12)
}
 0x191   : > { %s1185_s21 = smov 128   ;;  %s1186_s23 = smov 384  }
 0x192   : > { %s1187_s15 = smov 8  }
 0x193   : > { %802 = dma.vmem_to_hbm [thread:$0]  (%p1747_p2), %s1597_s18, 2048, %s1593_s2, %s1607_s12, %s1185_s21, %s1186_s23, %s1187_s15  }
 0x194 PF: > { %s1748_s10 = sld [smem:[#allocation11_spill]]  ;;  %p816_p9 = scmp.ge.s32.totalorder %s1177_s27, 2 }
 0x195   : > { %p1749_p0 = scmp.ne.s32.totalorder %s1734_s7, 0 }
 0x197   : > { %p812_p3 = pnand %p816_p9, %p1749_p0 }
 0x19a   : > { %s524_s22 = sand.u32 1, %s1748_s10  }
 0x19b   : > { %s525_s30 = scalar_lea.sflag [#allocation4], %s524_s22 }
 0x19c   : > { %1112 = dma.done.wait (!%p812_p3), %s525_s30, 2048  }
 0x19d   : > { %1114 = vsyncadd (!%p812_p3), %s525_s30, 4294965248  ;;  %s22_s27 = sadd.s32 1, %s1177_s27   ;;  %s1751_s18 = sld [smem:[#allocation12_spill]] }
 0x19e   : > { %p1636_p4 = scmp.ge.s32.totalorder %s22_s27, 14   ;;  %s1752_s17 = sld [smem:[#allocation19_spill]] }
 0x19f   : > { %s1753_s22 = sld [smem:[#allocation15_spill]]  ;;  %s1754_s7 = sld [smem:[#allocation16_spill]] }
 0x1a0   : > { %s1755_s25 = sld [smem:[#allocation17_spill]]  ;;  %s1756_s12 = smov %s1121_s13 }
 0x1a1   : > { %s1757_s13 = smov %s1125_s14  ;;  %s1758_s14 = smov %s1432_s5 }
 0x1a2   : > { %s1759_s15 = smov %s1133_s16  ;;  %s1764_s21 = smov %s1165_s24 }
 0x1a3   : > { %s1760_s16 = smov %s1751_s18  ;;  %s1761_s18 = smov %s1145_s19 }
 0x1a4   : > { %s1762_s19 = smov %s1149_s20  ;;  %s1763_s20 = smov %s1429_s9 }
 0x1a5   : > { %s1765_s23 = smov %s1173_s26  ;;  %s1766_s24 = smov %s1754_s7 }
 0x1a6   : > { %s1767_s26 = smov %s1777_s11  ;;  %21 = sbr.rel (!%p1636_p4) target bundleno = 17 (0x11), region = 93 }
 0x1ad   :  { %530 = vsyncpa [#allocation3], 1 }
 0x1ae   :  { %532 = vsyncpa [#allocation3 + $0x1], 1 }
 0x1af   :  { %533 = vsyncpa [#allocation6], 1 }
 0x1b0   :  { %535 = vsyncpa [#allocation6 + $0x1], 1 }
 0x1b1   :  { %536 = vsyncpa [#allocation4], 1 }
 0x1b2   :  { %538 = vsyncpa [#allocation4 + $0x1], 1 }

</bundles_post_ra>
